<compile_context>
chip_gen: v5e
topology: v5e:2x2
jax: 0.10.0
libtpu: 0.0.40
codegen_flags: <defaults>
</compile_context>

<pallas_src>
import functools

import jax
import jax.numpy as jnp
from jax.experimental import pallas as pl
from jax.experimental.pallas import tpu as pltpu

LANES = 128
SUBLANES = 8


def _focal_loss_kernel(x_ref, t_ref, o_ref, *, alpha, gamma, gamma_int,
                       logits, reduce):
    x = x_ref[...].astype(jnp.float32)
    t = t_ref[...].astype(jnp.float32)

    if logits:
        # F.binary_cross_entropy_with_logits (numerically stable form)
        bce = jnp.maximum(x, 0.0) - x * t + jnp.log1p(jnp.exp(-jnp.abs(x)))
    else:
        # F.binary_cross_entropy clamps log() at -100 (PyTorch semantics)
        log_p = jnp.maximum(jnp.log(x), -100.0)
        log_1mp = jnp.maximum(jnp.log(1.0 - x), -100.0)
        bce = -(t * log_p + (1.0 - t) * log_1mp)

    pt = jnp.exp(-bce)
    one_m_pt = 1.0 - pt

    if gamma_int is not None:
        # integer gamma: pure VPU multiplies (no exp/log on the EUP)
        if gamma_int == 0:
            w = jnp.ones_like(one_m_pt)
        else:
            w = one_m_pt
            for _ in range(gamma_int - 1):
                w = w * one_m_pt
    else:
        w = one_m_pt ** gamma

    f_loss = alpha * w * bce

    if reduce:
        # fold (row_tile, 128) -> (8, 128) partial sums: tile-aligned reshape,
        # vertical VPU adds only.  Cross-lane reduction happens in the wrapper.
        rt = f_loss.shape[0]
        o_ref[...] = jnp.sum(
            f_loss.reshape(rt // SUBLANES, SUBLANES, LANES), axis=0)
    else:
        o_ref[...] = f_loss


def focal_loss(inputs, targets, *, alpha=1.0, gamma=2.0, logits=False,
               reduce=True, max_row_tile=1024):
    """Pallas implementation of FocalLoss.forward.

    reduce=True  -> scalar f32 mean focal loss (torch.mean(F_loss)).
    reduce=False -> per-element focal loss with the input's shape (f32).
    """
    assert inputs.shape == targets.shape
    orig_shape = inputs.shape
    n = int(inputs.size)
    assert n > 0

    x = jnp.ravel(inputs)
    t = jnp.ravel(targets)

    # Adaptive row tile: large for big tensors (amortize grid-step overhead),
    # shrunk to the data for small tensors (avoid huge padding).
    rows_needed = -(-n // LANES)
    row_tile = min(int(max_row_tile),
                   ((rows_needed + SUBLANES - 1) // SUBLANES) * SUBLANES)
    row_tile = max(row_tile, SUBLANES)
    chunk = row_tile * LANES
    n_pad = ((n + chunk - 1) // chunk) * chunk
    pad = n_pad - n

    # Loss-neutral padding (so no validity-mask stream is needed).
    if logits:
        pad_x, pad_t = 100.0, 1.0   # bce == 0 exactly in f32
    else:
        pad_x, pad_t = 1.0, 1.0     # log(1)=0, t=1 -> bce == 0
    if pad:
        x = jnp.pad(x, (0, pad), constant_values=pad_x)
        t = jnp.pad(t, (0, pad), constant_values=pad_t)
        # TODO(synk): for very large ragged inputs the full-array pad could be
        # avoided by handling the tail in-kernel via an iota mask.

    rows = n_pad // LANES
    x2 = x.reshape(rows, LANES)
    t2 = t.reshape(rows, LANES)
    num_blocks = rows // row_tile

    gamma_f = float(gamma)
    gamma_int = (int(gamma_f)
                 if (gamma_f >= 0.0 and gamma_f == int(gamma_f)
                     and gamma_f <= 8.0)
                 else None)

    kernel = functools.partial(
        _focal_loss_kernel,
        alpha=float(alpha), gamma=gamma_f, gamma_int=gamma_int,
        logits=bool(logits), reduce=bool(reduce))

    in_specs = [
        pl.BlockSpec((row_tile, LANES), lambda i: (i, 0)),
        pl.BlockSpec((row_tile, LANES), lambda i: (i, 0)),
    ]

    if reduce:
        out_shape = jax.ShapeDtypeStruct((num_blocks * SUBLANES, LANES),
                                         jnp.float32)
        out_specs = pl.BlockSpec((SUBLANES, LANES), lambda i: (i, 0))
    else:
        out_shape = jax.ShapeDtypeStruct((rows, LANES), jnp.float32)
        out_specs = pl.BlockSpec((row_tile, LANES), lambda i: (i, 0))

    out = pl.pallas_call(
        kernel,
        out_shape=out_shape,
        grid_spec=pltpu.PrefetchScalarGridSpec(
            num_scalar_prefetch=0,
            grid=(num_blocks,),
            in_specs=in_specs,
            out_specs=out_specs,
        ),
        compiler_params=pltpu.CompilerParams(
            dimension_semantics=("parallel",)),
    )(x2, t2)

    if reduce:
        return jnp.sum(out) / jnp.float32(n)
    return jnp.ravel(out)[:n].reshape(orig_shape)


# ------------------------- pure-JAX reference -------------------------------
def _focal_loss_elem_ref(inputs, targets, alpha, gamma, logits):
    x = inputs.astype(jnp.float32)
    t = targets.astype(jnp.float32)
    if logits:
        bce = jnp.maximum(x, 0.0) - x * t + jnp.log1p(jnp.exp(-jnp.abs(x)))
    else:
        bce = -(t * jnp.maximum(jnp.log(x), -100.0)
                + (1.0 - t) * jnp.maximum(jnp.log(1.0 - x), -100.0))
    pt = jnp.exp(-bce)
    return alpha * (1.0 - pt) ** gamma * bce


def _focal_loss_ref(inputs, targets, alpha, gamma, logits):
    return jnp.mean(_focal_loss_elem_ref(inputs, targets, alpha, gamma, logits))


if __name__ == "__main__":
    # Module-level hyperparams from the experiment script.
    ALPHA = 0.75
    GAMMA = 2.0

    key = jax.random.PRNGKey(0)
    k1, k2, k3, k4 = jax.random.split(key, 4)

    # NCHW-shaped example (B=2, C=4, H=W=16); logits=False => inputs are probs.
    shape = (2, 4, 16, 16)
    inputs = jax.nn.sigmoid(jax.random.normal(k1, shape, dtype=jnp.float32))
    targets = (jax.random.uniform(k2, shape) > 0.5).astype(jnp.float32)

    # reduce=True (default path of the experiment)
    loss = focal_loss(inputs, targets, alpha=ALPHA, gamma=GAMMA,
                      logits=False, reduce=True)
    loss = jax.block_until_ready(loss)
    ref = _focal_loss_ref(inputs, targets, ALPHA, GAMMA, logits=False)
    assert jnp.allclose(loss, ref, rtol=1e-5, atol=1e-6), (loss, ref)

    # reduce=False (per-element) path
    per_elem = focal_loss(inputs, targets, alpha=ALPHA, gamma=GAMMA,
                          logits=False, reduce=False)
    per_elem = jax.block_until_ready(per_elem)
    ref_elem = _focal_loss_elem_ref(inputs, targets, ALPHA, GAMMA, logits=False)
    assert jnp.allclose(per_elem, ref_elem, rtol=1e-5, atol=1e-6)

    # logits=True path with a ragged (non-multiple-of-128) size -> exercises
    # the loss-neutral padding.
    rshape = (3, 5, 7)
    logits_in = jax.random.normal(k3, rshape, dtype=jnp.float32)
    rtargets = (jax.random.uniform(k4, rshape) > 0.5).astype(jnp.float32)
    loss_l = focal_loss(logits_in, rtargets, alpha=ALPHA, gamma=GAMMA,
                        logits=True, reduce=True)
    loss_l = jax.block_until_ready(loss_l)
    ref_l = _focal_loss_ref(logits_in, rtargets, ALPHA, GAMMA, logits=True)
    assert jnp.allclose(loss_l, ref_l, rtol=1e-5, atol=1e-6), (loss_l, ref_l)

    print("KERNEL_OK")
</pallas_src>

<mosaic_0001>
module attributes {stable_mosaic.version = 11 : i64} {
  func.func @_focal_loss_kernel(%arg0: i32, %arg1: memref<16x128xf32, #tpu.memory_space<vmem>>, %arg2: memref<16x128xf32, #tpu.memory_space<vmem>>, %arg3: memref<8x128xf32, #tpu.memory_space<vmem>>) attributes {dimension_semantics = [#tpu.dimension_semantics<parallel>], iteration_bounds = array<i64: 1>, scalar_prefetch = 0 : i64, scratch_operands = 0 : i64, tpu.core_type = #tpu.core_type<tc>, window_params = [{transform_indices = @transform_0, window_bounds = array<i64: 16, 128>}, {transform_indices = @transform_1, window_bounds = array<i64: 16, 128>}, {transform_indices = @transform_2, window_bounds = array<i64: 8, 128>}]} {
    %c0 = arith.constant 0 : index
    %c0_0 = arith.constant 0 : index
    %0 = vector.load %arg1[%c0, %c0_0] : memref<16x128xf32, #tpu.memory_space<vmem>>, vector<16x128xf32>
    %c0_1 = arith.constant 0 : index
    %c0_2 = arith.constant 0 : index
    %1 = vector.load %arg2[%c0_1, %c0_2] : memref<16x128xf32, #tpu.memory_space<vmem>>, vector<16x128xf32>
    %2 = math.log %0 : vector<16x128xf32>
    %cst = arith.constant -1.000000e+02 : f32
    %3 = vector.broadcast %cst : f32 to vector<16x128xf32>
    %4 = arith.maximumf %2, %3 : vector<16x128xf32>
    %cst_3 = arith.constant 1.000000e+00 : f32
    %5 = vector.broadcast %cst_3 : f32 to vector<16x128xf32>
    %6 = arith.subf %5, %0 : vector<16x128xf32>
    %7 = math.log %6 : vector<16x128xf32>
    %cst_4 = arith.constant -1.000000e+02 : f32
    %8 = vector.broadcast %cst_4 : f32 to vector<16x128xf32>
    %9 = arith.maximumf %7, %8 : vector<16x128xf32>
    %10 = arith.mulf %1, %4 : vector<16x128xf32>
    %cst_5 = arith.constant 1.000000e+00 : f32
    %11 = vector.broadcast %cst_5 : f32 to vector<16x128xf32>
    %12 = arith.subf %11, %1 : vector<16x128xf32>
    %13 = arith.mulf %12, %9 : vector<16x128xf32>
    %14 = arith.addf %10, %13 : vector<16x128xf32>
    %cst_6 = arith.constant 0.000000e+00 : f32
    %15 = vector.broadcast %cst_6 : f32 to vector<16x128xf32>
    %16 = arith.subf %15, %14 : vector<16x128xf32>
    %cst_7 = arith.constant 0.000000e+00 : f32
    %17 = vector.broadcast %cst_7 : f32 to vector<16x128xf32>
    %18 = arith.subf %17, %16 : vector<16x128xf32>
    %19 = math.exp %18 : vector<16x128xf32>
    %cst_8 = arith.constant 1.000000e+00 : f32
    %20 = vector.broadcast %cst_8 : f32 to vector<16x128xf32>
    %21 = arith.subf %20, %19 : vector<16x128xf32>
    %22 = arith.mulf %21, %21 : vector<16x128xf32>
    %cst_9 = arith.constant 7.500000e-01 : f32
    %23 = vector.broadcast %cst_9 : f32 to vector<16x128xf32>
    %24 = arith.mulf %23, %22 : vector<16x128xf32>
    %25 = arith.mulf %24, %16 : vector<16x128xf32>
    %26 = vector.shape_cast %25 : vector<16x128xf32> to vector<2x8x128xf32>
    %cst_10 = arith.constant dense<0.000000e+00> : vector<8x128xf32>
    %27 = vector.multi_reduction <add>, %26, %cst_10 [0] : vector<2x8x128xf32> to vector<8x128xf32>
    %c0_11 = arith.constant 0 : index
    %c0_12 = arith.constant 0 : index
    %28 = vector.load %arg3[%c0_11, %c0_12] : memref<8x128xf32, #tpu.memory_space<vmem>>, vector<8x128xf32>
    tpu.vector_store %arg3[%c0_11, %c0_12], %27 {strides = array<i32>} : memref<8x128xf32, #tpu.memory_space<vmem>>, vector<8x128xf32>,
    return
  }
  func.func @transform_0(%arg0: i32) -> (i32, i32) {
    %c0_i32 = arith.constant 0 : i32
    %c0_i32_0 = arith.constant 0 : i32
    return %arg0, %c0_i32 : i32, i32
  }
  func.func @transform_1(%arg0: i32) -> (i32, i32) {
    %c0_i32 = arith.constant 0 : i32
    %c0_i32_0 = arith.constant 0 : i32
    return %arg0, %c0_i32 : i32, i32
  }
  func.func @transform_2(%arg0: i32) -> (i32, i32) {
    %c0_i32 = arith.constant 0 : i32
    %c0_i32_0 = arith.constant 0 : i32
    return %arg0, %c0_i32 : i32, i32
  }
}

</mosaic_0001>

<bundles_post_ra>
// kernel: tpu_custom_call.1
= control target key start
LH: loop header
LB: loop body
LE: loop exit
PB: predicated region body
PF: predicated region fallthrough
CT: control target
= control target key end

     0   :  { %7 = vsyncpa [#allocation3], 0  ;;  %s230_s0 = inlined_call_operand.hbm [shape: f32[16,128], index: 0, kind: input, shape index: {}]   ;;  %s231_s1 = inlined_call_operand.hbm [shape: f32[16,128], index: 1, kind: input, shape index: {}]   ;;  %s232_s2 = inlined_call_operand.hbm [shape: f32[8,128], index: 2, kind: output, shape index: {}]  }
   0x1   :  { %8 = vsyncpa [#allocation6], 0 }
   0x2   :  { %9 = vsyncpa [#allocation4], 0  ;;  %s14_s11 = sshll.u32 %s230_s0, 4  ;;  %s201_s12 = smov [#allocation2]   ;;  %s15_s11 = int_to_ptr.hbm [resolvable:$true] %s14_s11 }
   0x3   :  { %s16_s13 = sshll.u32 %s201_s12, 4  ;;  %s27_s16 = sshll.u32 %s231_s1, 4  ;;  %s17_s13 = int_to_ptr.vmem [resolvable:$true] %s16_s13  ;;  %s28_s16 = int_to_ptr.hbm [resolvable:$true] %s27_s16 }
   0x4   :  { %s202_s17 = smov 128   ;;  %s203_s18 = smov 8  }
   0x5   :  { %22 = dma.hbm_to_vmem [thread:$0]  %s15_s11, 256, %s17_s13, [#allocation3], %s202_s17, %s202_s17, %s203_s18  }
   0x6   :  { %s204_s19 = smov [#allocation5]  }
   0x7   :  { %s29_s20 = sshll.u32 %s204_s19, 4  ;;  %s30_s20 = int_to_ptr.vmem [resolvable:$true] %s29_s20 }
   0x8   :  { %35 = dma.hbm_to_vmem [thread:$0]  %s28_s16, 256, %s30_s20, [#allocation6], %s202_s17, %s202_s17, %s203_s18  }
   0x9   :  { %195 = dma.done.wait [#allocation3], 256  }
   0xa   :  { %196 = vsyncadd [#allocation3], 4294967040 }
   0xb   :  { %197 = dma.done.wait [#allocation6], 256  }
   0xc   :  { %198 = vsyncadd [#allocation6], 4294967040  ;;  %v44_v0 = vld [vmem:[#allocation2] sm:$0xff]  ;;  %v45_v1 = vld [vmem:[#allocation2 + $0x8] sm:$0xff]  ;;  %s205_s0 = smov [#allocation7]   ;;  %s95_s23 = sshll.u32 %s232_s2, 4  ;;  %s96_s23 = int_to_ptr.hbm [resolvable:$true] %s95_s23 }
   0xd   :  { %111 = vlog2.f32 %v44_v0  ;;  %v54_v2 = vsub.f32 1.0, %v44_v0  ;;  %v55_v3 = vsub.f32 1.0, %v45_v1  ;;  %v46_v5 = vld [vmem:[#allocation5] sm:$0xff]  ;;  %v47_v7 = vld [vmem:[#allocation5 + $0x8] sm:$0xff]  ;;  %s93_s1 = sshll.u32 %s205_s0, 4  ;;  %s94_s1 = int_to_ptr.vmem [resolvable:$true] %s93_s1 }
   0xe   :  { %113 = vlog2.f32 %v45_v1  ;;  %v64_v14 = vsub.f32 1.0, %v46_v5  ;;  %v65_v17 = vsub.f32 1.0, %v47_v7 }
   0xf   :  { %115 = vlog2.f32 %v54_v2 }
  0x10   :  { %117 = vlog2.f32 %v55_v3 }
  0x13   :  { %v112_v4 = vpop.eup %111 }
  0x14   :  { %v114_v6 = vpop.eup %113  ;;  %v49_v8 = vmul.f32 0.6931472, %v112_v4 }
  0x15   :  { %v116_v9 = vpop.eup %115  ;;  %v51_v10 = vmul.f32 0.6931472, %v114_v6 }
  0x16   :  { %v118_v11 = vpop.eup %117  ;;  %v52_v12 = vmax.f32 %v49_v8, -100.0  ;;  %v57_v13 = vmul.f32 0.6931472, %v116_v9 }
  0x17   :  { %v53_v15 = vmax.f32 %v51_v10, -100.0  ;;  %v59_v16 = vmul.f32 0.6931472, %v118_v11 }
  0x18   :  { %v60_v18 = vmax.f32 %v57_v13, -100.0  ;;  %v62_v19 = vmul.f32 %v52_v12, %v46_v5 }
  0x19   :  { %v61_v20 = vmax.f32 %v59_v16, -100.0  ;;  %v63_v21 = vmul.f32 %v53_v15, %v47_v7 }
  0x1a   :  { %v66_v22 = vmul.f32 %v64_v14, %v60_v18 }
  0x1b   :  { %v67_v23 = vmul.f32 %v65_v17, %v61_v20 }
  0x1c   :  { %v68_v24 = vadd.f32 %v66_v22, %v62_v19 }
  0x1d   :  { %v69_v25 = vadd.f32 %v67_v23, %v63_v21 }
  0x1e   :  { %v70_v26 = vsub.f32 0.0, %v68_v24 }
  0x1f   :  { %v71_v27 = vsub.f32 0.0, %v69_v25 }
  0x20   :  { %v72_v28 = vsub.f32 0.0, %v70_v26 }
  0x21   :  { %v73_v29 = vsub.f32 0.0, %v71_v27 }
  0x22   :  { %v74_v30 = vmul.f32 1.442695, %v72_v28 }
  0x23   :  { %v76_v31 = vmul.f32 1.442695, %v73_v29 }
  0x24   :  { %119 = vpow2.f32 %v74_v30 }
  0x25   :  { %121 = vpow2.f32 %v76_v31 }
  0x2a   :  { %v120_v32 = vpop.eup %119 }
  0x2b   :  { %v122_v33 = vpop.eup %121  ;;  %v78_v34 = vsub.f32 1.0, %v120_v32 }
  0x2c   :  { %v79_v35 = vsub.f32 1.0, %v122_v33 }
  0x2d   :  { %v80_v36 = vmul.f32 %v78_v34, %v78_v34 }
  0x2e   :  { %v81_v37 = vmul.f32 %v79_v35, %v79_v35 }
  0x2f   :  { %v82_v38 = vmul.f32 0.75, %v80_v36 }
  0x30   :  { %v83_v39 = vmul.f32 0.75, %v81_v37 }
  0x31   :  { %v84_v40 = vmul.f32 %v82_v38, %v70_v26 }
  0x32   :  { %v85_v41 = vmul.f32 %v83_v39, %v71_v27 }
  0x34   :  { %v86_v42 = vadd.f32 %v85_v41, %v84_v40 }
  0x36   :  { %87 = vst [vmem:[#allocation7] sm:$0xff] %v86_v42 }
  0x37   :  { %98 = dma.vmem_to_hbm [thread:$0]  %s94_s1, 128, %s96_s23, [#allocation4]  }
  0x38   :  { %199 = dma.done.wait [#allocation4], 128  }
  0x39   :  { %200 = vsyncadd [#allocation4], 4294967168 }
  0x3a   :  { %103 = vsyncpa [#allocation3], 1 }
  0x3b   :  { %104 = vsyncpa [#allocation6], 1 }
  0x3c   :  { %105 = vsyncpa [#allocation4], 1 }

</bundles_post_ra>
